<compile_context>
chip_gen: v5e
topology: v5e:2x2
jax: 0.10.0
libtpu: 0.0.40
codegen_flags: <defaults>
</compile_context>

<pallas_src>
import math

import numpy as np
import jax
import jax.numpy as jnp
from jax import lax
from jax.experimental import pallas as pl
from jax.experimental.pallas import tpu as pltpu

WINDOW_SIZE = 5
SIGMA = 3.5


def _gauss_1d(window_size=WINDOW_SIZE, sigma=SIGMA):
    """Normalized 1D Gaussian, identical to gaussian(5, 3.5) in the spec."""
    g = np.array(
        [math.exp(-(x - window_size // 2) ** 2 / (2.0 * sigma ** 2))
         for x in range(window_size)],
        dtype=np.float64)
    g = g / g.sum()
    return g.astype(np.float32)


def _make_window_2d():
    g = _gauss_1d()
    return np.outer(g, g).astype(np.float32)


def _band_matrix(n, g1d):
    """Banded Toeplitz matrix M with M[a, b] = g[b - a + pad] for |a-b| <= pad.

    x @ M applies the 1D Gaussian along the last axis of x with implicit zero
    padding (out-of-range taps simply have no band entry);  M @ x applies it
    along the first axis.  g is symmetric, so the same constructor serves both.
    """
    K = len(g1d)
    pad = K // 2
    m = np.zeros((n, n), dtype=np.float32)
    for a in range(n):
        for b in range(max(0, a - pad), min(n, a + pad + 1)):
            m[a, b] = g1d[b - a + pad]
    return m


def _ncmse_kernel_factory(TB):
    HIGH = lax.Precision.HIGHEST

    def kernel(org_ref, gt_ref, out_ref, ah_ref, bw_ref, partial_ref):
        ah = ah_ref[...]                       # (H, H) banded Gaussian (rows)
        bw = bw_ref[...]                       # (W, W) banded Gaussian (cols)

        def body(b, total):
            x = org_ref[b] - gt_ref[b]         # (H, W) noise, fused in-kernel
            x2 = x * x

            # Separable 5-tap Gaussian conv as two banded matmuls on the MXU.
            r1 = jnp.dot(x, bw, precision=HIGH,
                         preferred_element_type=jnp.float32)
            r2 = jnp.dot(x2, bw, precision=HIGH,
                         preferred_element_type=jnp.float32)
            mu = jnp.dot(ah, r1, precision=HIGH,
                         preferred_element_type=jnp.float32)
            ex2 = jnp.dot(ah, r2, precision=HIGH,
                          preferred_element_type=jnp.float32)
            sigma_sq = ex2 - mu * mu           # (H, W)

            d = out_ref[b] - gt_ref[b]
            d2 = d * d

            # LogSoftmax over the flattened image (C == 1 -> H*W), applied in
            # restructured single-pass form:
            #   sum((s - (m + lse)) * d2) == sum(s*d2) - (m + lse)*sum(d2)
            m = jnp.max(sigma_sq)
            lse = jnp.log(jnp.sum(jnp.exp(sigma_sq - m)))
            return total + (jnp.sum(sigma_sq * d2) - (m + lse) * jnp.sum(d2))

        total = lax.fori_loop(0, TB, body, jnp.zeros((), jnp.float32),
                              unroll=min(2, TB))
        partial_ref[...] = total.reshape(1, 1, 1)

    return kernel


def ncmse(out_image, gt_image, org_image):
    """NCMSE loss: mean( LogSoftmax(STD(org - gt)) * (out - gt)^2 )."""
    B, C, H, W = out_image.shape
    assert C == 1, "STD's grouped conv (channel=1) requires a single channel"

    g1d = _gauss_1d()

    org_s = org_image[:, 0].astype(jnp.float32)   # (B, H, W)
    gt_s = gt_image[:, 0].astype(jnp.float32)
    out_s = out_image[:, 0].astype(jnp.float32)

    ah = jnp.asarray(_band_matrix(H, g1d))        # (H, H)
    bw = jnp.asarray(_band_matrix(W, g1d))        # (W, W)

    # --- VMEM-aware batch-block sizing -------------------------------------
    try:
        vmem_cap = int(pltpu.get_tpu_info().vmem_capacity_bytes)
    except Exception:                              # no hw info available
        vmem_cap = 64 * 1024 * 1024                # v7x physical (smallest)
    vmem_limit = min((vmem_cap * 3) // 4, 100 * 1024 * 1024)

    # Per image, the double-buffered input blocks cost 3 * 2 * H*W*4 bytes;
    # leave >50% of the limit for in-kernel intermediates / compiler scratch.
    per_image_bytes = 3 * 2 * H * W * 4
    tb_budget = max(1, (int(vmem_limit * 0.45)) // max(per_image_bytes, 1))
    # Keep G >= 2 so the "parallel" batch axis gives both v7x TensorCores work.
    tb_cap = B if B <= 1 else -(-B // 2)
    TB = int(max(1, min(tb_budget, tb_cap)))
    G = -(-B // TB)                                # cdiv
    Bp = G * TB
    if Bp != B:
        # Zero-padded images contribute exactly 0 to the loss sum (d == 0).
        z = jnp.zeros((Bp - B, H, W), jnp.float32)
        org_s = jnp.concatenate([org_s, z], axis=0)
        gt_s = jnp.concatenate([gt_s, z], axis=0)
        out_s = jnp.concatenate([out_s, z], axis=0)

    kernel = _ncmse_kernel_factory(TB)

    flops_per_image = 4 * H * W * (H + W) + 12 * H * W
    cost = pl.CostEstimate(
        flops=int(Bp * flops_per_image),
        transcendentals=int(Bp * (H * W + 1)),
        bytes_accessed=int(3 * Bp * H * W * 4 + (H * H + W * W) * 4 + G * 4),
    )

    partials = pl.pallas_call(
        kernel,
        out_shape=jax.ShapeDtypeStruct((G, 1, 1), jnp.float32),
        grid_spec=pltpu.PrefetchScalarGridSpec(
            num_scalar_prefetch=0,
            grid=(G,),
            in_specs=[
                pl.BlockSpec((TB, H, W), lambda g: (g, 0, 0)),   # org
                pl.BlockSpec((TB, H, W), lambda g: (g, 0, 0)),   # gt
                pl.BlockSpec((TB, H, W), lambda g: (g, 0, 0)),   # out
                pl.BlockSpec((H, H), lambda g: (0, 0)),          # Ah (const)
                pl.BlockSpec((W, W), lambda g: (0, 0)),          # Bw (const)
            ],
            out_specs=pl.BlockSpec((1, 1, 1), lambda g: (g, 0, 0)),
        ),
        compiler_params=pltpu.CompilerParams(
            dimension_semantics=("parallel",),
            vmem_limit_bytes=int(vmem_limit),
        ),
        cost_estimate=cost,
    )(org_s, gt_s, out_s, ah, bw)

    return jnp.sum(partials) / (B * C * H * W)


def _ncmse_reference(out_image, gt_image, org_image):
    """Pure-JAX reference for correctness checking."""
    window = jnp.asarray(_make_window_2d())[None, None]   # (1, 1, 5, 5)
    pad = WINDOW_SIZE // 2

    def conv(x):
        return jax.lax.conv_general_dilated(
            x, window, window_strides=(1, 1),
            padding=[(pad, pad), (pad, pad)],
            dimension_numbers=("NCHW", "OIHW", "NCHW"),
            precision=jax.lax.Precision.HIGHEST)

    noise = org_image - gt_image
    mu = conv(noise)
    sigma_sq = conv(noise * noise) - mu * mu
    B, C, H, W = sigma_sq.shape
    flat = sigma_sq.reshape(B, -1)
    noise_map = jax.nn.log_softmax(flat, axis=1).reshape(B, C, H, W)
    return jnp.mean(noise_map * (out_image - gt_image) ** 2)


if __name__ == "__main__":
    key = jax.random.PRNGKey(0)
    k1, k2, k3 = jax.random.split(key, 3)
    B, C, H, W = 2, 1, 16, 16
    out_image = jax.random.normal(k1, (B, C, H, W), dtype=jnp.float32)
    gt_image = jax.random.normal(k2, (B, C, H, W), dtype=jnp.float32)
    org_image = jax.random.normal(k3, (B, C, H, W), dtype=jnp.float32)

    loss = ncmse(out_image, gt_image, org_image)
    jax.block_until_ready(loss)

    ref = _ncmse_reference(out_image, gt_image, org_image)
    np.testing.assert_allclose(np.asarray(loss), np.asarray(ref),
                               rtol=1e-4, atol=1e-4)

    print("KERNEL_OK")
</pallas_src>

<mosaic_0001>
module attributes {stable_mosaic.version = 11 : i64} {
  func.func @kernel(%arg0: i32, %arg1: memref<1x16x16xf32, #tpu.memory_space<vmem>>, %arg2: memref<1x16x16xf32, #tpu.memory_space<vmem>>, %arg3: memref<1x16x16xf32, #tpu.memory_space<vmem>>, %arg4: memref<16x16xf32, #tpu.memory_space<vmem>>, %arg5: memref<16x16xf32, #tpu.memory_space<vmem>>, %arg6: memref<1x1x1xf32, #tpu.memory_space<vmem>>) attributes {dimension_semantics = [#tpu.dimension_semantics<parallel>], iteration_bounds = array<i64: 2>, scalar_prefetch = 0 : i64, scratch_operands = 0 : i64, tpu.core_type = #tpu.core_type<tc>, window_params = [{transform_indices = @transform_0, window_bounds = array<i64: 1, 16, 16>}, {transform_indices = @transform_1, window_bounds = array<i64: 1, 16, 16>}, {transform_indices = @transform_2, window_bounds = array<i64: 1, 16, 16>}, {pipeline_mode = #tpu.pipeline_mode<synchronous>, transform_indices = @transform_3, window_bounds = array<i64: 16, 16>}, {pipeline_mode = #tpu.pipeline_mode<synchronous>, transform_indices = @transform_4, window_bounds = array<i64: 16, 16>}, {transform_indices = @transform_5, window_bounds = array<i64: 1, 1, 1>}]} {
    %c0 = arith.constant 0 : index
    %c0_0 = arith.constant 0 : index
    %0 = vector.load %arg4[%c0, %c0_0] : memref<16x16xf32, #tpu.memory_space<vmem>>, vector<16x16xf32>
    %c0_1 = arith.constant 0 : index
    %c0_2 = arith.constant 0 : index
    %1 = vector.load %arg5[%c0_1, %c0_2] : memref<16x16xf32, #tpu.memory_space<vmem>>, vector<16x16xf32>
    %cst = arith.constant 0.000000e+00 : f32
    %c0_i32 = arith.constant 0 : i32
    %2 = arith.index_cast %c0_i32 : i32 to index
    %c0_3 = arith.constant 0 : index
    %c0_4 = arith.constant 0 : index
    %3 = vector.load %arg1[%2, %c0_3, %c0_4] : memref<1x16x16xf32, #tpu.memory_space<vmem>>, vector<1x16x16xf32>
    %4 = vector.shape_cast %3 : vector<1x16x16xf32> to vector<16x16xf32>
    %5 = arith.index_cast %c0_i32 : i32 to index
    %c0_5 = arith.constant 0 : index
    %c0_6 = arith.constant 0 : index
    %6 = vector.load %arg2[%5, %c0_5, %c0_6] : memref<1x16x16xf32, #tpu.memory_space<vmem>>, vector<1x16x16xf32>
    %7 = vector.shape_cast %6 : vector<1x16x16xf32> to vector<16x16xf32>
    %8 = arith.subf %4, %7 : vector<16x16xf32>
    %9 = arith.mulf %8, %8 : vector<16x16xf32>
    %cst_7 = arith.constant dense<0.000000e+00> : vector<16x16xf32>
    %10 = tpu.matmul %8, %1, %cst_7 {dimension_numbers = #tpu.dot_dimension_numbers<[1], [0], [0], [1], [0, 0, 1, 1], [], []>, precision = #tpu.contract_precision<fp32>} : vector<16x16xf32>, vector<16x16xf32>, vector<16x16xf32> -> vector<16x16xf32>
    %cst_8 = arith.constant dense<0.000000e+00> : vector<16x16xf32>
    %11 = tpu.matmul %9, %1, %cst_8 {dimension_numbers = #tpu.dot_dimension_numbers<[1], [0], [0], [1], [0, 0, 1, 1], [], []>, precision = #tpu.contract_precision<fp32>} : vector<16x16xf32>, vector<16x16xf32>, vector<16x16xf32> -> vector<16x16xf32>
    %cst_9 = arith.constant dense<0.000000e+00> : vector<16x16xf32>
    %12 = tpu.matmul %0, %10, %cst_9 {dimension_numbers = #tpu.dot_dimension_numbers<[1], [0], [0], [1], [0, 0, 1, 1], [], []>, precision = #tpu.contract_precision<fp32>} : vector<16x16xf32>, vector<16x16xf32>, vector<16x16xf32> -> vector<16x16xf32>
    %cst_10 = arith.constant dense<0.000000e+00> : vector<16x16xf32>
    %13 = tpu.matmul %0, %11, %cst_10 {dimension_numbers = #tpu.dot_dimension_numbers<[1], [0], [0], [1], [0, 0, 1, 1], [], []>, precision = #tpu.contract_precision<fp32>} : vector<16x16xf32>, vector<16x16xf32>, vector<16x16xf32> -> vector<16x16xf32>
    %14 = arith.mulf %12, %12 : vector<16x16xf32>
    %15 = arith.subf %13, %14 : vector<16x16xf32>
    %16 = arith.index_cast %c0_i32 : i32 to index
    %c0_11 = arith.constant 0 : index
    %c0_12 = arith.constant 0 : index
    %17 = vector.load %arg3[%16, %c0_11, %c0_12] : memref<1x16x16xf32, #tpu.memory_space<vmem>>, vector<1x16x16xf32>
    %18 = vector.shape_cast %17 : vector<1x16x16xf32> to vector<16x16xf32>
    %19 = arith.index_cast %c0_i32 : i32 to index
    %c0_13 = arith.constant 0 : index
    %c0_14 = arith.constant 0 : index
    %20 = vector.load %arg2[%19, %c0_13, %c0_14] : memref<1x16x16xf32, #tpu.memory_space<vmem>>, vector<1x16x16xf32>
    %21 = vector.shape_cast %20 : vector<1x16x16xf32> to vector<16x16xf32>
    %22 = arith.subf %18, %21 : vector<16x16xf32>
    %23 = arith.mulf %22, %22 : vector<16x16xf32>
    %24 = vector.shape_cast %15 : vector<16x16xf32> to vector<1x16x16xf32>
    %cst_15 = arith.constant dense<0xFF800000> : vector<1xf32>
    %25 = vector.multi_reduction <maximumf>, %24, %cst_15 [1, 2] : vector<1x16x16xf32> to vector<1xf32>
    %26 = vector.shape_cast %25 : vector<1xf32> to vector<1x1x1xf32>
    %27 = vector.extract %26[0, 0, 0] : f32 from vector<1x1x1xf32>
    %28 = vector.broadcast %27 : f32 to vector<16x16xf32>
    %29 = arith.subf %15, %28 : vector<16x16xf32>
    %30 = math.exp %29 : vector<16x16xf32>
    %31 = vector.shape_cast %30 : vector<16x16xf32> to vector<1x16x16xf32>
    %cst_16 = arith.constant dense<0.000000e+00> : vector<1xf32>
    %32 = vector.multi_reduction <add>, %31, %cst_16 [1, 2] : vector<1x16x16xf32> to vector<1xf32>
    %33 = vector.shape_cast %32 : vector<1xf32> to vector<1x1x1xf32>
    %34 = vector.extract %33[0, 0, 0] : f32 from vector<1x1x1xf32>
    %35 = math.log %34 : f32
    %36 = arith.mulf %15, %23 : vector<16x16xf32>
    %37 = vector.shape_cast %36 : vector<16x16xf32> to vector<1x16x16xf32>
    %cst_17 = arith.constant dense<0.000000e+00> : vector<1xf32>
    %38 = vector.multi_reduction <add>, %37, %cst_17 [1, 2] : vector<1x16x16xf32> to vector<1xf32>
    %39 = vector.shape_cast %38 : vector<1xf32> to vector<1x1x1xf32>
    %40 = vector.extract %39[0, 0, 0] : f32 from vector<1x1x1xf32>
    %41 = arith.addf %27, %35 : f32
    %42 = vector.shape_cast %23 : vector<16x16xf32> to vector<1x16x16xf32>
    %cst_18 = arith.constant dense<0.000000e+00> : vector<1xf32>
    %43 = vector.multi_reduction <add>, %42, %cst_18 [1, 2] : vector<1x16x16xf32> to vector<1xf32>
    %44 = vector.shape_cast %43 : vector<1xf32> to vector<1x1x1xf32>
    %45 = vector.extract %44[0, 0, 0] : f32 from vector<1x1x1xf32>
    %46 = arith.mulf %41, %45 : f32
    %47 = arith.subf %40, %46 : f32
    %48 = arith.addf %cst, %47 : f32
    %c1_i32 = arith.constant 1 : i32
    %49 = vector.broadcast %48 : f32 to vector<1x1x1xf32>
    %c0_19 = arith.constant 0 : index
    %c0_20 = arith.constant 0 : index
    %c0_21 = arith.constant 0 : index
    %50 = vector.load %arg6[%c0_19, %c0_20, %c0_21] : memref<1x1x1xf32, #tpu.memory_space<vmem>>, vector<1x1x1xf32>
    tpu.vector_store %arg6[%c0_19, %c0_20, %c0_21], %49 {strides = array<i32>} : memref<1x1x1xf32, #tpu.memory_space<vmem>>, vector<1x1x1xf32>,
    return
  }
  func.func @transform_0(%arg0: i32) -> (i32, i32, i32) {
    %c0_i32 = arith.constant 0 : i32
    %c0_i32_0 = arith.constant 0 : i32
    %c0_i32_1 = arith.constant 0 : i32
    return %arg0, %c0_i32, %c0_i32_0 : i32, i32, i32
  }
  func.func @transform_1(%arg0: i32) -> (i32, i32, i32) {
    %c0_i32 = arith.constant 0 : i32
    %c0_i32_0 = arith.constant 0 : i32
    %c0_i32_1 = arith.constant 0 : i32
    return %arg0, %c0_i32, %c0_i32_0 : i32, i32, i32
  }
  func.func @transform_2(%arg0: i32) -> (i32, i32, i32) {
    %c0_i32 = arith.constant 0 : i32
    %c0_i32_0 = arith.constant 0 : i32
    %c0_i32_1 = arith.constant 0 : i32
    return %arg0, %c0_i32, %c0_i32_0 : i32, i32, i32
  }
  func.func @transform_3(%arg0: i32) -> (i32, i32) {
    %c0_i32 = arith.constant 0 : i32
    %c0_i32_0 = arith.constant 0 : i32
    %c0_i32_1 = arith.constant 0 : i32
    return %c0_i32, %c0_i32_0 : i32, i32
  }
  func.func @transform_4(%arg0: i32) -> (i32, i32) {
    %c0_i32 = arith.constant 0 : i32
    %c0_i32_0 = arith.constant 0 : i32
    %c0_i32_1 = arith.constant 0 : i32
    return %c0_i32, %c0_i32_0 : i32, i32
  }
  func.func @transform_5(%arg0: i32) -> (i32, i32, i32) {
    %c0_i32 = arith.constant 0 : i32
    %c0_i32_0 = arith.constant 0 : i32
    %c0_i32_1 = arith.constant 0 : i32
    return %arg0, %c0_i32, %c0_i32_0 : i32, i32, i32
  }
}

</mosaic_0001>

<bundles_post_ra>
// kernel: tpu_custom_call.1
= control target key start
LH: loop header
LB: loop body
LE: loop exit
PB: predicated region body
PF: predicated region fallthrough
CT: control target
= control target key end

     0   :  { %s1965_s0 = inlined_call_operand.hbm [shape: f32[2,16,16], index: 0, kind: input, shape index: {}]   ;;  %s1966_s1 = inlined_call_operand.hbm [shape: f32[2,16,16], index: 1, kind: input, shape index: {}]   ;;  %s1967_s2 = inlined_call_operand.hbm [shape: f32[2,16,16], index: 2, kind: input, shape index: {}]   ;;  %s1968_s3 = inlined_call_operand.hbm [shape: f32[16,16], index: 3, kind: input, shape index: {}]   ;;  %s1969_s4 = inlined_call_operand.hbm [shape: f32[16,16], index: 4, kind: input, shape index: {}]   ;;  %s1970_s5 = inlined_call_operand.vmem [shape: f32[2,1,1], index: 5, kind: output, shape index: {}]  }
   0x1   :  { %1972 = sst [smem:[#allocation13_spill]] %s1966_s1 }
   0x2   :  { %10 = vsyncpa [#allocation3], 0 }
   0x3   :  { %12 = vsyncpa [#allocation3 + $0x1], 0 }
   0x4   :  { %13 = vsyncpa [#allocation5], 0 }
   0x5   :  { %15 = vsyncpa [#allocation5 + $0x1], 0 }
   0x6   :  { %16 = vsyncpa [#allocation8], 0  ;;  %s1688_s18 = smov 0   ;;  %s1690_s19 = smov 0  }
   0x7   :  { %s1692_s20 = smov 0   ;;  %s1694_s21 = smov 0  }
   0x8 LB: > { %s1707_s22 = sadd.s32 4294967295, %s1652_s21   ;;  %p42_p0 = scmp.ne.s32.totalorder %s1644_s19, %s1640_s18  ;;  %s1652_s21 = sphi %s1694_s21, %s1982_s21   ;;  %s1648_s20 = sphi %s1692_s20, %s1981_s20   ;;  %s1644_s19 = sphi %s1690_s19, %s1980_s19   ;;  %s1640_s18 = sphi %s1688_s18, %s1979_s18  }
   0x9   : > { %p43_p1 = scmp.eq.s32.totalorder %s1707_s22, 0  ;;  %p1348_p2 = scmp.ge.s32.totalorder %s1652_s21, 1 }
   0xa   : > { %p173_p3 = scmp.lt.s32.totalorder %s1652_s21, 3  ;;  %s184_s26 = sshll.u32 %s1968_s3, 4  ;;  %s185_s26 = int_to_ptr.hbm [resolvable:$true] %s184_s26 }
   0xb   : > { %p1715_p4 = por %p43_p1, %p42_p0  ;;  %s1654_s28 = smov [#allocation7]  }
   0xc   : > { %p1722_p5 = pnand %p1348_p2, %p173_p3  ;;  %s186_s29 = sshll.u32 %s1654_s28, 4  ;;  %s187_s29 = int_to_ptr.vmem [resolvable:$true] %s186_s29 }
   0xd   : > { %s1735_s6 = sadd.s32 1, %s1652_s21   ;;  %s1655_s7 = smov 128  }
   0xe   : > { %p1396_p6 = pneg %p1722_p5  ;;  %s1656_s8 = smov 8  }
   0xf   : > { %s26_s9 = ssub.s32 %s1652_s21, %s1735_s6  ;;  %s29_s10 = sadd.s32 1, %s1648_s20 }
  0x10   : > { %p1730_p7 = pnand %p1396_p6, %p43_p1  ;;  %p27_p8 = scmp.eq.s32.totalorder %s26_s9, 0 }
  0x11   : > { %p36_p9 = scmp.ne.s32.totalorder %s1648_s20, %s1644_s19  ;;  %p37_p10 = scmp.eq.s32.totalorder %s1652_s21, 0 }
  0x12   : > { %1399 = dma.hbm_to_vmem [thread:$0]  (!%p1730_p7), %s185_s26, 256, %s187_s29, [#allocation8], %s1655_s7, %s1655_s7, %s1656_s8  }
  0x13   : > { %p1415_p11 = scmp.lt.s32.totalorder %s1652_s21, 2  ;;  %p38_p12 = por %p37_p10, %p36_p9 }
  0x14   : > { %s1750_s11 = scalar_select %p27_p8, %s1648_s20, %s29_s10  }
  0x15   : > { %s1971_s12 = sand.u32 1, %s1648_s20   ;;  %s1758_s14 = sshll.u32 %s1652_s21, 4 }
  0x16   : > { %s1755_s13 = sshll.u32 %s1971_s12, 4  ;;  %p1760_p13 = pnand %p1415_p11, %p38_p12 }
  0x17   : > { %s236_s16 = sand.u32 1, %s1652_s21   ;;  %s1977_s1 = sld [smem:[#allocation13_spill]] }
  0x18   : > { %s240_s26 = scalar_lea.vmem [#allocation4], %s1755_s13  ;;  %s1770_s29 = scalar_lea.sflag [#allocation5], %s236_s16 }
  0x19   : > { %s248_s28 = sshll.u32 %s240_s26, 4  ;;  %p1494_p2 = pneg %p1760_p13  ;;  %s249_s28 = int_to_ptr.vmem [resolvable:$true] %s248_s28 }
  0x1d   : > { %s245_s24 = scalar_lea.hbm %s1977_s1, %s1758_s14  ;;  %s1497_s18 = scalar_lea.hbm %s1977_s1, 32 }
  0x1e   : > { %s246_s25 = sshll.u32 %s245_s24, 4  ;;  %s247_s25 = int_to_ptr.hbm [resolvable:$true] %s246_s25 }
  0x1f   : > { %s1490_s9 = sshra.s32 %s247_s25, 4  ;;  %s1491_s9 = int_to_ptr.hbm [resolvable:$true] %s1490_s9 }
  0x20   : > { %s1492_s10 = scalar_lea.hbm %s1491_s9, 16  ;;  %p1498_p8 = scmp.lt.s32.totalorder %s1491_s9, %s1977_s1 }
  0x21   : > { %p1493_p0 = scmp.ne.s32.totalorder %s1491_s9, %s1492_s10  ;;  %p1499_p9 = scmp.lt.s32.totalorder %s1497_s18, %s1492_s10 }
  0x23   : > { %p1495_p3 = pnand %p1494_p2, %p1493_p0  ;;  %p1500_p10 = por %p1499_p9, %p1498_p8 }
  0x25   : > { %p1496_p6 = pneg %p1495_p3 }
  0x27   : > { %p1501_p11 = pnand %p1500_p10, %p1496_p6 }
  0x29   : > { %1504 = shalt.err (!%p1501_p11)
}
  0x2a   : > { %1409 = dma.hbm_to_vmem [thread:$0]  (!%p1760_p13), %s247_s25, 256, %s249_s28, %s1770_s29, %s1655_s7, %s1655_s7, %s1656_s8  }
  0x2b   : > { %s198_s17 = sshll.u32 %s1969_s4, 4  ;;  %s1657_s9 = smov [#allocation9]   ;;  %s199_s17 = int_to_ptr.hbm [resolvable:$true] %s198_s17 }
  0x2c   : > { %s200_s10 = sshll.u32 %s1657_s9, 4  ;;  %s223_s26 = scalar_lea.hbm %s1965_s0, %s1758_s14  ;;  %s201_s10 = int_to_ptr.vmem [resolvable:$true] %s200_s10 }
  0x2d   : > { %1402 = dma.hbm_to_vmem [thread:$0]  (!%p1730_p7), %s199_s17, 256, %s201_s10, [#allocation8], %s1655_s7, %s1655_s7, %s1656_s8  }
  0x2e   : > { %s224_s12 = sshll.u32 %s223_s26, 4  ;;  %s218_s25 = scalar_lea.vmem [#allocation2], %s1755_s13  ;;  %s225_s12 = int_to_ptr.hbm [resolvable:$true] %s224_s12 }
  0x2f   : > { %s226_s28 = sshll.u32 %s218_s25, 4  ;;  %s1978_s16 = sand.u32 1, %s1648_s20   ;;  %s227_s28 = int_to_ptr.vmem [resolvable:$true] %s226_s28 }
  0x30   : > { %s215_s21 = scalar_lea.sflag [#allocation3], %s1978_s16  ;;  %s1550_s1 = sshra.s32 %s225_s12, 4  ;;  %s1551_s1 = int_to_ptr.hbm [resolvable:$true] %s1550_s1 }
  0x31   : > { %s1552_s9 = scalar_lea.hbm %s1551_s1, 16  ;;  %s1557_s10 = scalar_lea.hbm %s1965_s0, 32 }
  0x32   : > { %p1553_p12 = scmp.ne.s32.totalorder %s1551_s1, %s1552_s9  ;;  %p1558_p7 = scmp.lt.s32.totalorder %s1551_s1, %s1965_s0 }
  0x33   : > { %p1559_p6 = scmp.lt.s32.totalorder %s1557_s10, %s1552_s9 }
  0x34   : > { %p1555_p0 = pnand %p1553_p12, %p1494_p2 }
  0x35   : > { %p1560_p8 = por %p1559_p6, %p1558_p7 }
  0x36   : > { %p1556_p3 = pneg %p1555_p0 }
  0x38   : > { %p1561_p9 = pnand %p1560_p8, %p1556_p3 }
  0x3a   : > { %1564 = shalt.err (!%p1561_p9)
}
  0x3b   : > { %1406 = dma.hbm_to_vmem [thread:$0]  (!%p1760_p13), %s225_s12, 256, %s227_s28, %s215_s21, %s1655_s7, %s1655_s7, %s1656_s8  }
  0x3c   : > { %s267_s16 = scalar_lea.hbm %s1967_s2, %s1758_s14  ;;  %s262_s17 = scalar_lea.vmem [#allocation6], %s1755_s13 }
  0x3d   : > { %s268_s30 = sshll.u32 %s267_s16, 4  ;;  %s270_s1 = sshll.u32 %s262_s17, 4  ;;  %s269_s30 = int_to_ptr.hbm [resolvable:$true] %s268_s30  ;;  %s271_s1 = int_to_ptr.vmem [resolvable:$true] %s270_s1 }
  0x3e   : > { %s1580_s9 = sshra.s32 %s269_s30, 4  ;;  %s1587_s12 = scalar_lea.hbm %s1967_s2, 32  ;;  %s1581_s9 = int_to_ptr.hbm [resolvable:$true] %s1580_s9 }
  0x3f   : > { %s1582_s10 = scalar_lea.hbm %s1581_s9, 16  ;;  %p1588_p0 = scmp.lt.s32.totalorder %s1581_s9, %s1967_s2 }
  0x40   : > { %p1583_p10 = scmp.ne.s32.totalorder %s1581_s9, %s1582_s10  ;;  %p1589_p3 = scmp.lt.s32.totalorder %s1587_s12, %s1582_s10 }
  0x42   : > { %p1585_p11 = pnand %p1583_p10, %p1494_p2  ;;  %p1590_p7 = por %p1589_p3, %p1588_p0 }
  0x44   : > { %p1586_p12 = pneg %p1585_p11 }
  0x46   : > { %p1591_p6 = pnand %p1590_p7, %p1586_p12 }
  0x48   : > { %1594 = shalt.err (!%p1591_p6)
}
  0x49   : > { %1412 = dma.hbm_to_vmem [thread:$0]  (!%p1760_p13), %s269_s30, 256, %s271_s1, %s1770_s29, %s1655_s7, %s1655_s7, %s1656_s8  }
  0x4a   : > { %282 = sbr.rel (%p1722_p5) target bundleno = 891 (0x37b), region = 40  ;;  %s284_s13 = sand.u32 (!%p1722_p5), 1, %s1644_s19  }
  0x4b   : > { %s1841_s14 = sshll.u32 (!%p1722_p5), %s284_s13, 4  ;;  %s285_s26 = scalar_lea.sflag (!%p1722_p5), [#allocation3], %s284_s13 }
  0x4c   : > { %s288_s25 = scalar_lea.vmem (!%p1722_p5), [#allocation2], %s1841_s14 }
  0x4f   : > { %1627 = dma.done.wait (%p1715_p4), %s285_s26, 256  }
  0x50   : > { %1629 = vsyncadd (%p1715_p4), %s285_s26, 4294967040  ;;  %s294_s7 = sand.u32 1, %s1707_s22   ;;  %s298_s27 = scalar_lea.vmem [#allocation4], %s1841_s14 }
  0x51   : > { %s295_s8 = scalar_lea.sflag [#allocation5], %s294_s7 }
  0x52   : > { %1631 = dma.done.wait (%p1715_p4), %s295_s8, 512  }
  0x53   : > { %1633 = vsyncadd (%p1715_p4), %s295_s8, 4294966784  ;;  %s308_s15 = scalar_lea.vmem [#allocation6], %s1841_s14 }
  0x54   : > { %1635 = dma.done.wait (%p43_p1), [#allocation8], 512  }
  0x55   : > { %1637 = vsyncadd (%p43_p1), [#allocation8], 4294966784  ;;  %v360_v0 = vld [vmem:[#allocation9 + $0x8] sm:$0xff]  ;;  %v359_v1 = vld [vmem:[#allocation9] sm:$0xff]  ;;  %vm369_vm0 = vcmask 130048   ;;  %p354_p1 = scmp.lt.s32.totalorder %s1707_s22, 1 }
  0x56   : > { %v361_v2 = vld [vmem:[%s288_s25] sm:$0xff]  ;;  %v1859_v3 = vand.u32 4294901760, %v360_v0  ;;  %v1861_v4 = vand.u32 4294901760, %v359_v1  ;;  %v362_v6 = vld [vmem:[%s288_s25 + $0x8] sm:$0xff]  ;;  %vm1224_vm1 = vcmask 0  }
  0x57   : > { %v1863_v5 = vld [vmem:[%s298_s27] sm:$0xff]  ;;  %v1865_v7 = vld [vmem:[%s298_s27 + $0x8] sm:$0xff]  ;;  %s1984_s22 = smov (!%p354_p1, %s1707_s22), 1 }
  0x58   : > { %v365_v8 = vsub.f32 %v361_v2, %v1863_v5  ;;  %v366_v9 = vsub.f32 %v362_v6, %v1865_v7  ;;  %v426_v10 = vsub.f32 %v360_v0, %v1859_v3  ;;  %v432_v11 = vsub.f32 %v359_v1, %v1861_v4  ;;  %492 = vmatpush.msra.mxu3 %v1859_v3  ;;  %v357_v52 = vld [vmem:[#allocation7] sm:$0xff]  ;;  %v358_v62 = vld [vmem:[#allocation7 + $0x8] sm:$0xff]  ;;  %s356_s24 = scalar_lea.vmem %s1970_s5, %s1984_s22 }
  0x59   : > { %391 = vmatpush.msra.mxu0 %v1859_v3  ;;  %v763_v55 = vsel %vm369_vm0, %v357_v52, 0 }
  0x5a   : > { %v367_v12 = vmul.f32 %v365_v8, %v365_v8  ;;  %v371_v13 = vsel %vm369_vm0, %v365_v8, 0  ;;  %v374_v14 = vsel %vm369_vm0, %v366_v9, 0  ;;  %462 = vmatpush.msra.mxu2 %v426_v10  ;;  %v427_v16 = vand.u32 4294901760, %v426_v10  ;;  %494 = vmatpush.msra.mxu3 %v1861_v4 }
  0x5b   : > { %v394_v15 = vand.u32 4294901760, %v371_v13  ;;  %v433_v17 = vand.u32 4294901760, %v432_v11  ;;  %v402_v18 = vand.u32 4294901760, %v374_v14  ;;  %393 = vmatpush.msra.mxu0 %v1861_v4  ;;  %v368_v19 = vmul.f32 %v366_v9, %v366_v9 }
  0x5c   : > { %v567_v20 = vsel %vm369_vm0, %v367_v12, 0  ;;  %465 = vmatpush.msra.mxu2 %v432_v11  ;;  %v428_v22 = vsub.f32 %v426_v10, %v427_v16  ;;  %v1888_v56 = vand.u32 4294901760, %v763_v55 }
  0x5d   : > { %v395_v21 = vsub.f32 %v371_v13, %v394_v15  ;;  %v434_v23 = vsub.f32 %v432_v11, %v433_v17  ;;  %v403_v24 = vsub.f32 %v374_v14, %v402_v18  ;;  %525 = vmatpush.msrb.mxu0 %v427_v16  ;;  %v590_v25 = vand.u32 4294901760, %v567_v20 }
  0x5e   : > { %587 = vmatpush.msrb.mxu2 %v1859_v3  ;;  %v429_v26 = vand.u32 4294901760, %v428_v22  ;;  %v570_v30 = vsel %vm369_vm0, %v368_v19, 0  ;;  %v1891_v1 = vsub.f32 %v763_v55, %v1888_v56 }
  0x5f   : > { %468 = vmatmul.f32.vlgmr.msra.gmra.mxu2 %v395_v21  ;;  %v396_v27 = vand.u32 4294901760, %v395_v21  ;;  %v435_v28 = vand.u32 4294901760, %v434_v23  ;;  %v591_v29 = vsub.f32 %v567_v20, %v590_v25  ;;  %529 = vmatpush.msrb.mxu0 %v433_v17  ;;  %v404_v32 = vand.u32 4294901760, %v403_v24 }
  0x60   : > { %589 = vmatpush.msrb.mxu2 %v1861_v4  ;;  %430 = vmatpush.msra.mxu1 %v429_v26  ;;  %v598_v35 = vand.u32 4294901760, %v570_v30  ;;  %v1895_v6 = vand.u32 4294901760, %v1891_v1 }
  0x61   : > { %498 = vmatmul.f32.vlgmr.msra.gmra.mxu3 %v396_v27  ;;  %v397_v31 = vsub.f32 %v395_v21, %v396_v27  ;;  %v592_v34 = vand.u32 4294901760, %v591_v29  ;;  %v405_v36 = vsub.f32 %v403_v24, %v404_v32 }
  0x62   : > { %626 = vmatpush.msrb.mxu3 %v429_v26  ;;  %721 = vmatpush.msra.mxu2 %v427_v16  ;;  %v599_v38 = vsub.f32 %v570_v30, %v598_v35  ;;  %v789_v16 = vsub.f32 %v1891_v1, %v1895_v6 }
  0x63   : > { %436 = vmatpush.msra.mxu1 %v435_v28  ;;  %v398_v33 = vand.u32 4294901760, %v397_v31  ;;  %v593_v37 = vsub.f32 %v591_v29, %v592_v34  ;;  %v406_v39 = vand.u32 4294901760, %v405_v36 }
  0x64   : > { %438 = vmatmul.f32.vlgmr.msra.gmra.mxu1 %v394_v15  ;;  %632 = vmatpush.msrb.mxu3 %v435_v28  ;;  %v600_v41 = vand.u32 4294901760, %v599_v38  ;;  %v790_v21 = vand.u32 4294901760, %v789_v16 }
  0x65   : > { %399 = vmatmul.f32.vlgmr.msra.gmra.mxu0 %v398_v33  ;;  %554 = vmatpush.msrb.mxu1 %v1859_v3  ;;  %v594_v40 = vand.u32 4294901760, %v593_v37 }
  0x66   : > { %658 = vmatpush.msra.mxu0 %v426_v10  ;;  %725 = vmatpush.msra.mxu2 %v433_v17  ;;  %v601_v42 = vsub.f32 %v599_v38, %v600_v41 }
  0x67   : > { %473 = vmatmul.f32.gmra.mxu2 %v403_v24  ;;  %556 = vmatpush.msrb.mxu1 %v1861_v4 }
  0x68   : > { %750 = vmatpush.msra.mxu3 %v1859_v3  ;;  %661 = vmatpush.msra.mxu0 %v432_v11  ;;  %v602_v43 = vand.u32 4294901760, %v601_v42 }
  0x69   : > { %504 = vmatmul.f32.gmra.mxu3 %v404_v32  ;;  %688 = vmatpush.msra.mxu1 %v1859_v3 }
  0x6a   : > { %752 = vmatpush.msra.mxu3 %v1861_v4 }
  0x6b   : > { %690 = vmatpush.msra.mxu1 %v1861_v4  ;;  %v766_v4 = vsel %vm369_vm0, %v358_v62, 0 }
  0x6c   : > { %442 = vmatmul.f32.gmra.mxu1 %v402_v18  ;;  %v1897_v8 = vand.u32 4294901760, %v766_v4 }
  0x6d   : > { %407 = vmatmul.f32.gmra.mxu0 %v406_v39 }
  0x6e   : > { %v1902_v17 = vsub.f32 %v766_v4, %v1897_v8 }
  0x6f   : > { %595 = vmatmul.f32.vlgmr.msrb.gmra.mxu2 %v594_v40 }
  0x70   : > { %v1905_v22 = vand.u32 4294901760, %v1902_v17 }
  0x71   : > { %634 = vmatmul.f32.vlgmr.msrb.gmra.mxu3 %v590_v25 }
  0x72   : > { %v797_v32 = vsub.f32 %v1902_v17, %v1905_v22 }
  0x74   : > { %558 = vmatmul.f32.vlgmr.msrb.gmra.mxu1 %v394_v15 }
  0x75   : > { %531 = vmatmul.f32.vlgmr.msrb.gmra.mxu0 %v394_v15 }
  0x77   : > { %603 = vmatmul.f32.gmra.mxu2 %v602_v43 }
  0x79   : > { %638 = vmatmul.f32.gmra.mxu3 %v598_v35 }
  0x7c   : > { %562 = vmatmul.f32.gmra.mxu1 %v402_v18 }
  0x7d   : > { %535 = vmatmul.f32.gmra.mxu0 %v402_v18 }
  0x7f   : > { %727 = vmatmul.f32.vlgmr.msra.gmra.mxu2 %v590_v25 }
  0x81   : > { %754 = vmatmul.f32.vlgmr.msra.gmra.mxu3 %v590_v25 }
  0x84   : > { %694 = vmatmul.f32.vlgmr.msra.gmra.mxu1 %v592_v34 }
  0x85   : > { %664 = vmatmul.f32.vlgmr.msra.gmra.mxu0 %v591_v29 }
  0x87   : > { %731 = vmatmul.f32.gmra.mxu2 %v598_v35 }
  0x89   : > { %758 = vmatmul.f32.gmra.mxu3 %v598_v35 }
  0x8c   : > { %700 = vmatmul.f32.gmra.mxu1 %v600_v41 }
  0x8d   : > { %669 = vmatmul.f32.gmra.mxu0 %v599_v38  ;;  %v798_v38 = vand.u32 4294901760, %v797_v32 }
  0xe1   : > { %v439_v44 = vpop.f32.mrf.mxu1 }
  0xe2   : > { %v400_v45 = vpop.f32.mrf.mxu0  ;;  %v469_v46 = vpop.f32.mrf.mxu2 }
  0xe3   : > { %v440_v48 = vadd.f32 %v439_v44, %v400_v45 }
  0xe4   : > { %v499_v47 = vpop.f32.mrf.mxu3 }
  0xe5   : > { %v470_v54 = vadd.f32 %v469_v46, %v440_v48 }
  0xe7   : > { %v500_v57 = vadd.f32 %v499_v47, %v470_v54 }
  0xe9   : > { %v443_v49 = vpop.f32.mrf.mxu1 }
  0xea   : > { %v408_v50 = vpop.f32.mrf.mxu0  ;;  %v474_v51 = vpop.f32.mrf.mxu2 }
  0xeb   : > { %v444_v58 = vadd.f32 %v443_v49, %v408_v50 }
  0xec   : > { %v505_v53 = vpop.f32.mrf.mxu3 }
  0xed   : > { %v475_v2 = vadd.f32 %v474_v51, %v444_v58 }
  0xef   : > { %v506_v9 = vadd.f32 %v505_v53, %v475_v2 }
  0xf1   : > { %v559_v59 = vpop.f32.mrf.mxu1 }
  0xf2   : > { %v532_v60 = vpop.f32.mrf.mxu0  ;;  %v596_v61 = vpop.f32.mrf.mxu2 }
  0xf3   : > { %v533_v63 = vadd.f32 %v532_v60, %v500_v57 }
  0xf4   : > { %v635_v0 = vpop.f32.mrf.mxu3 }
  0xf5   : > { %v560_v3 = vadd.f32 %v559_v59, %v533_v63  ;;  %v636_v23 = vadd.f32 %v635_v0, %v596_v61 }
  0xf7   : > { %v784_v10 = vand.u32 4294901760, %v560_v3 }
  0xf9   : > { %v563_v11 = vpop.f32.mrf.mxu1  ;;  %v824_v18 = vsub.f32 %v560_v3, %v784_v10 }
  0xfa   : > { %v536_v12 = vpop.f32.mrf.mxu0  ;;  %v604_v13 = vpop.f32.mrf.mxu2 }
  0xfb   : > { %v537_v14 = vadd.f32 %v536_v12, %v506_v9  ;;  %v825_v26 = vand.u32 4294901760, %v824_v18 }
  0xfc   : > { %v639_v15 = vpop.f32.mrf.mxu3 }
  0xfd   : > { %v564_v19 = vadd.f32 %v563_v11, %v537_v14  ;;  %v826_v35 = vsub.f32 %v824_v18, %v825_v26  ;;  %v640_v39 = vadd.f32 %v639_v15, %v604_v13 }
  0xff   : > { %v782_v20 = vand.u32 4294901760, %v564_v19  ;;  %v827_v41 = vand.u32 4294901760, %v826_v35  ;;  %v1153_v35 = vld [vmem:[%s308_s15 + $0x8] sm:$0xff] }
 0x101   : > { %v818_v24 = vsub.f32 %v564_v19, %v782_v20  ;;  %783 = vmatpush.msrb.mxu0 %v782_v20  ;;  %884 = vmatpush.msrb.mxu3 %v782_v20  ;;  %v695_v25 = vpop.f32.mrf.mxu1 }
 0x102   : > { %v665_v27 = vpop.f32.mrf.mxu0  ;;  %v728_v28 = vpop.f32.mrf.mxu2 }
 0x103   : > { %v819_v29 = vand.u32 4294901760, %v818_v24  ;;  %v666_v30 = vadd.f32 %v665_v27, %v636_v23  ;;  %785 = vmatpush.msrb.mxu0 %v784_v10  ;;  %854 = vmatpush.msrb.mxu2 %v818_v24 }
 0x104   : > { %886 = vmatpush.msrb.mxu3 %v784_v10  ;;  %v755_v31 = vpop.f32.mrf.mxu3  ;;  %791 = vmatmul.f32.vlgmr.msrb.gmra.mxu0 %v790_v21 }
 0x105   : > { %v820_v33 = vsub.f32 %v818_v24, %v819_v29  ;;  %v696_v34 = vadd.f32 %v695_v25, %v666_v30  ;;  %857 = vmatpush.msrb.mxu2 %v824_v18  ;;  %917 = vmatpush.msra.mxu0 %v819_v29 }
 0x106   : > { %860 = vmatmul.f32.vlgmr.msrb.gmra.mxu2 %v1891_v1  ;;  %890 = vmatmul.f32.vlgmr.msrb.gmra.mxu3 %v1895_v6 }
 0x107   : > { %v729_v36 = vadd.f32 %v728_v28, %v696_v34  ;;  %921 = vmatpush.msra.mxu0 %v825_v26  ;;  %v821_v37 = vand.u32 4294901760, %v820_v33 }
 0x109   : > { %v756_v40 = vadd.f32 %v755_v31, %v729_v36  ;;  %822 = vmatpush.msrb.mxu1 %v821_v37  ;;  %v701_v43 = vpop.f32.mrf.mxu1  ;;  %v1152_v31 = vld [vmem:[%s308_s15] sm:$0xff] }
 0x10a   : > { %v670_v42 = vpop.f32.mrf.mxu0  ;;  %v732_v45 = vpop.f32.mrf.mxu2 }
 0x10b   : > { %v671_v44 = vadd.f32 %v670_v42, %v640_v39  ;;  %828 = vmatpush.msrb.mxu1 %v827_v41  ;;  %v974_v46 = vand.u32 4294901760, %v756_v40  ;;  %v1154_v39 = vsub.f32 %v1152_v31, %v1863_v5 }
 0x10c   : > { %799 = vmatmul.f32.gmra.mxu0 %v798_v38  ;;  %830 = vmatmul.f32.vlgmr.msrb.gmra.mxu1 %v1888_v56  ;;  %v759_v48 = vpop.f32.mrf.mxu3 }
 0x10d   : > { %946 = vmatpush.msra.mxu1 %v782_v20  ;;  %v702_v47 = vadd.f32 %v701_v43, %v671_v44  ;;  %v1014_v50 = vsub.f32 %v756_v40, %v974_v46  ;;  %v1155_v43 = vsub.f32 %v1153_v35, %v1865_v7 }
 0x10e   : > { %865 = vmatmul.f32.gmra.mxu2 %v1902_v17  ;;  %896 = vmatmul.f32.gmra.mxu3 %v1905_v22 }
 0x10f   : > { %948 = vmatpush.msra.mxu1 %v784_v10  ;;  %v733_v49 = vadd.f32 %v732_v45, %v702_v47  ;;  %v1015_v54 = vand.u32 4294901760, %v1014_v50 }
 0x111   : > { %v760_v51 = vadd.f32 %v759_v48, %v733_v49  ;;  %v1016_v58 = vsub.f32 %v1014_v50, %v1015_v54 }
 0x113   : > { %v972_v52 = vand.u32 4294901760, %v760_v51  ;;  %v1017_v60 = vand.u32 4294901760, %v1016_v58 }
 0x114   : > { %923 = vmatmul.f32.vlgmr.msra.gmra.mxu0 %v1888_v56  ;;  %834 = vmatmul.f32.gmra.mxu1 %v1897_v8 }
 0x115   : > { %v1008_v53 = vsub.f32 %v760_v51, %v972_v52  ;;  %973 = vmatpush.msra.mxu2 %v972_v52  ;;  %1074 = vmatpush.msrb.mxu1 %v972_v52 }
 0x117   : > { %v1009_v55 = vand.u32 4294901760, %v1008_v53  ;;  %975 = vmatpush.msra.mxu2 %v974_v46  ;;  %1044 = vmatpush.msrb.mxu0 %v1008_v53 }
 0x118   : > { %1076 = vmatpush.msrb.mxu1 %v974_v46  ;;  %981 = vmatmul.f32.vlgmr.msra.gmra.mxu2 %v790_v21 }
 0x119   : > { %v1010_v57 = vsub.f32 %v1008_v53, %v1009_v55  ;;  %1047 = vmatpush.msrb.mxu0 %v1014_v50  ;;  %1107 = vmatpush.msrb.mxu2 %v1009_v55  ;;  %v1157_v50 = vmul.f32 %v1155_v43, %v1155_v43 }
 0x11b   : > { %1111 = vmatpush.msrb.mxu2 %v1015_v54  ;;  %v1011_v59 = vand.u32 4294901760, %v1010_v57 }
 0x11c   : > { %927 = vmatmul.f32.gmra.mxu0 %v1897_v8  ;;  %950 = vmatmul.f32.vlgmr.msra.gmra.mxu1 %v1888_v56 }
 0x11d   : > { %1012 = vmatpush.msra.mxu3 %v1011_v59 }
 0x11f   : > { %1018 = vmatpush.msra.mxu3 %v1017_v60 }
 0x120   : > { %1020 = vmatmul.f32.vlgmr.msra.gmra.mxu3 %v1888_v56  ;;  %989 = vmatmul.f32.gmra.mxu2 %v798_v38 }
 0x121   : > { %1136 = vmatpush.msrb.mxu3 %v972_v52 }
 0x123   : > { %1138 = vmatpush.msrb.mxu3 %v974_v46  ;;  %v1156_v46 = vmul.f32 %v1154_v39, %v1154_v39 }
 0x124   : > { %1050 = vmatmul.f32.vlgmr.msrb.gmra.mxu0 %v1891_v1  ;;  %954 = vmatmul.f32.gmra.mxu1 %v1897_v8 }
 0x128   : > { %1024 = vmatmul.f32.gmra.mxu3 %v1897_v8  ;;  %1113 = vmatmul.f32.vlgmr.msrb.gmra.mxu2 %v1888_v56 }
 0x12c   : > { %1055 = vmatmul.f32.gmra.mxu0 %v1902_v17  ;;  %1080 = vmatmul.f32.vlgmr.msrb.gmra.mxu1 %v1895_v6 }
 0x130   : > { %1140 = vmatmul.f32.vlgmr.msrb.gmra.mxu3 %v1888_v56  ;;  %1117 = vmatmul.f32.gmra.mxu2 %v1897_v8 }
 0x134   : > { %1086 = vmatmul.f32.gmra.mxu1 %v1905_v22 }
 0x138   : > { %1144 = vmatmul.f32.gmra.mxu3 %v1897_v8 }
 0x181   : > { %v792_v61 = vpop.f32.mrf.mxu0 }
 0x189   : > { %v861_v62 = vpop.f32.mrf.mxu2  ;;  %v831_v63 = vpop.f32.mrf.mxu1 }
 0x18a   : > { %v800_v0 = vpop.f32.mrf.mxu0  ;;  %v891_v1 = vpop.f32.mrf.mxu3  ;;  %v832_v14 = vadd.f32 %v831_v63, %v792_v61 }
 0x18c   : > { %v862_v16 = vadd.f32 %v861_v62, %v832_v14 }
 0x18e   : > { %v892_v21 = vadd.f32 %v891_v1, %v862_v16 }
 0x191   : > { %v866_v2 = vpop.f32.mrf.mxu2  ;;  %v835_v3 = vpop.f32.mrf.mxu1 }
 0x192   : > { %v924_v4 = vpop.f32.mrf.mxu0  ;;  %v897_v9 = vpop.f32.mrf.mxu3  ;;  %v836_v8 = vadd.f32 %v835_v3, %v800_v0  ;;  %v1209_v3 = vsel %vm369_vm0, %v1157_v50, 0.0 }
 0x193   : > { %v925_v28 = vadd.f32 %v924_v4, %v892_v21 }
 0x194   : > { %v867_v22 = vadd.f32 %v866_v2, %v836_v8  ;;  %v1208_v2 = vsel %vm369_vm0, %v1156_v46, 0.0 }
 0x195   : > { %v1210_v4 = vadd.f32 %v1209_v3, %v1208_v2 }
 0x196   : > { %v898_v27 = vadd.f32 %v897_v9, %v867_v22 }
 0x199   : > { %v951_v10 = vpop.f32.mrf.mxu1 }
 0x19a   : > { %v928_v6 = vpop.f32.mrf.mxu0  ;;  %v952_v32 = vadd.f32 %v951_v10, %v925_v28 }
 0x19b   : > { %v982_v11 = vpop.f32.mrf.mxu2  ;;  %v929_v36 = vadd.f32 %v928_v6, %v898_v27 }
 0x19c   : > { %v1148_v41 = vmul.f32 %v952_v32, %v952_v32 }
 0x1a1   : > { %v955_v56 = vpop.f32.mrf.mxu1 }
 0x1a2   : > { %v1051_v15 = vpop.f32.mrf.mxu0  ;;  %v956_v42 = vadd.f32 %v955_v56, %v929_v36 }
 0x1a3   : > { %v1021_v12 = vpop.f32.mrf.mxu3  ;;  %v990_v13 = vpop.f32.mrf.mxu2 }
 0x1a4   : > { %v1022_v17 = vadd.f32 %v1021_v12, %v982_v11  ;;  %v1149_v48 = vmul.f32 %v956_v42, %v956_v42 }
 0x1a6   : > { %v1052_v23 = vadd.f32 %v1051_v15, %v1022_v17 }
 0x1a9   : > { %v1081_v19 = vpop.f32.mrf.mxu1 }
 0x1aa   : > { %v1082_v25 = vadd.f32 %v1081_v19, %v1052_v23  ;;  %v1056_v26 = vpop.f32.mrf.mxu0 }
 0x1ab   : > { %v1025_v18 = vpop.f32.mrf.mxu3  ;;  %v1114_v20 = vpop.f32.mrf.mxu2 }
 0x1ac   : > { %v1026_v24 = vadd.f32 %v1025_v18, %v990_v13  ;;  %v1115_v33 = vadd.f32 %v1114_v20, %v1082_v25 }
 0x1ae   : > { %v1057_v34 = vadd.f32 %v1056_v26, %v1026_v24 }
 0x1b1   : > { %v1087_v30 = vpop.f32.mrf.mxu1 }
 0x1b2   : > { %v1088_v38 = vadd.f32 %v1087_v30, %v1057_v34 }
 0x1b3   : > { %v1141_v29 = vpop.f32.mrf.mxu3  ;;  %v1118_v40 = vpop.f32.mrf.mxu2 }
 0x1b4   : > { %v1142_v37 = vadd.f32 %v1141_v29, %v1115_v33  ;;  %v1119_v45 = vadd.f32 %v1118_v40, %v1088_v38 }
 0x1b6   : > { %v1150_v44 = vsub.f32 %v1142_v37, %v1148_v41 }
 0x1b8   : > { %v1193_v52 = vmul.f32 %v1156_v46, %v1150_v44  ;;  %v1158_v53 = vsel %vm369_vm0, %v1150_v44, -inf }
 0x1ba   : > { %v1195_v57 = vsel %vm369_vm0, %v1193_v52, 0.0 }
 0x1bb   : > { %v1145_v47 = vpop.f32.mrf.mxu3 }
 0x1bc   : > { %v1146_v49 = vadd.f32 %v1145_v47, %v1119_v45 }
 0x1be   : > { %v1151_v51 = vsub.f32 %v1146_v49, %v1149_v48 }
 0x1c0   : > { %v1159_v54 = vsel %vm369_vm0, %v1151_v51, -inf  ;;  %v1194_v55 = vmul.f32 %v1157_v50, %v1151_v51 }
 0x1c1   : > { %v1160_v5 = vmax.f32 %v1158_v53, %v1159_v54 }
 0x1c2   : > { %v1196_v58 = vsel %vm369_vm0, %v1194_v55, 0.0 }
 0x1c3   : > { %1161 = vmax.xlane.f32.xlu0 %v1160_v5  ;;  %v1197_v7 = vadd.f32 %v1196_v58, %v1195_v57 }
 0x1c5   : > { %1198 = vadd.xlane.f32.xlu1 %v1197_v7 }
 0x1cd   : > { %1211 = vadd.xlane.f32.xlu1 %v1210_v4 }
 0x236   : > { %v1162_v59 = vpop.xlane.xlu0 %1161 }
 0x237   : > { %v1163_v60 = vrot.slane %v1162_v59, 4 }
 0x238   : > { %v1199_v23 = vpop.xlane.xlu1 %1198 }
 0x239   : > { %v1164_v61 = vmax.f32 %v1162_v59, %v1163_v60  ;;  %v1200_v25 = vrot.slane %v1199_v23, 4 }
 0x23b   : > { %v1165_v62 = vrot.slane %v1164_v61, 2  ;;  %v1201_v27 = vadd.f32 %v1200_v25, %v1199_v23 }
 0x23d   : > { %v1166_v63 = vmax.f32 %v1164_v61, %v1165_v62  ;;  %v1202_v29 = vrot.slane %v1201_v27, 2 }
 0x23f   : > { %v1167_v0 = vrot.slane %v1166_v63, 1  ;;  %v1203_v32 = vadd.f32 %v1202_v29, %v1201_v27 }
 0x240   : > { %v1212_v24 = vpop.xlane.xlu1 %1211 }
 0x241   : > { %v1168_v1 = vmax.f32 %v1166_v63, %v1167_v0  ;;  %v1213_v26 = vrot.slane %v1212_v24, 4  ;;  %v1204_v34 = vrot.slane %v1203_v32, 1 }
 0x243   : > { %1372 = vpush %v1168_v1  ;;  %v1214_v28 = vadd.f32 %v1213_v26, %v1212_v24  ;;  %v1205_v38 = vadd.f32 %v1204_v34, %v1203_v32 }
 0x245   : > { %v1215_v30 = vrot.slane %v1214_v28, 2 }
 0x247   : > { %v1216_v33 = vadd.f32 %v1215_v30, %v1214_v28 }
 0x249   : > { %v1217_v35 = vrot.slane %v1216_v33, 1 }
 0x24b   : > { %v1218_v39 = vadd.f32 %v1217_v35, %v1216_v33 }
 0x274   : > { %s1941_s23 = spop %1372 }
 0x275   : > { %v1170_v9 = vstv %s1941_s23 }
 0x276   : > { %v1171_v10 = vsub.f32 %v1150_v44, %v1170_v9  ;;  %v1172_v11 = vsub.f32 %v1151_v51, %v1170_v9 }
 0x278   : > { %v1173_v6 = vmul.f32 1.442695, %v1171_v10  ;;  %v1175_v12 = vmul.f32 1.442695, %v1172_v11 }
 0x27a   : > { %1454 = vpow2.f32 %v1173_v6 }
 0x27b   : > { %1456 = vpow2.f32 %v1175_v12 }
 0x280   : > { %v1455_v56 = vpop.eup %1454 }
 0x281   : > { %v1457_v13 = vpop.eup %1456  ;;  %v1177_v14 = vsel %vm369_vm0, %v1455_v56, 0.0 }
 0x282   : > { %v1178_v15 = vsel %vm369_vm0, %v1457_v13, 0.0 }
 0x283   : > { %v1179_v16 = vadd.f32 %v1178_v15, %v1177_v14 }
 0x285   : > { %1180 = vadd.xlane.f32.xlu0 %v1179_v16 }
 0x2f8   : > { %v1181_v8 = vpop.xlane.xlu0 %1180 }
 0x2f9   : > { %v1182_v17 = vrot.slane %v1181_v8, 4 }
 0x2fb   : > { %v1183_v18 = vadd.f32 %v1182_v17, %v1181_v8 }
 0x2fd   : > { %v1184_v19 = vrot.slane %v1183_v18, 2 }
 0x2ff   : > { %v1185_v20 = vadd.f32 %v1184_v19, %v1183_v18 }
 0x301   : > { %v1186_v21 = vrot.slane %v1185_v20, 1 }
 0x303   : > { %v1187_v22 = vadd.f32 %v1186_v21, %v1185_v20 }
 0x305   : > { %1374 = vpush %v1187_v22 }
 0x336   : > { %s1375_s29 = spop %1374 }
 0x337   : > { %v1189_v31 = vstv %s1375_s29 }
 0x338   : > { %1458 = vlog2.f32 %v1189_v31 }
 0x33e   : > { %v1459_v36 = vpop.eup %1458 }
 0x33f   : > { %v1191_v37 = vmul.f32 0.6931472, %v1459_v36 }
 0x341   : > { %1376 = vpush %v1191_v37 }
 0x342   : > { %1378 = vpush %v1205_v38 }
 0x343   : > { %1380 = vpush %v1218_v39 }
 0x372   : > { %s1377_s16 = spop %1376 }
 0x373   : > { %s1207_s30 = sadd.f32 %s1377_s16, %s1941_s23  ;;  %s1379_s17 = spop %1378 }
 0x374   : > { %s1381_s1 = spop %1380 }
 0x375   : > { %s1220_s9 = smul.f32 %s1381_s1, %s1207_s30 }
 0x377   : > { %s1221_s12 = ssub.f32 %s1379_s17, %s1220_s9 }
 0x379   : > { %v1223_v40 = vstv %s1221_s12 }
 0x37a   : > { %1225 = vst.msk [vmem:[%s356_s24] sm:$0x1] %vm1224_vm1, %v1223_v40 }
 0x37b PF: > { %p19_p4 = scmp.ge.s32.totalorder %s1735_s6, 4   ;;  %s1979_s18 = smov %s1644_s19 }
 0x37c   : > { %s1980_s19 = smov %s1648_s20  ;;  %s1981_s20 = smov %s1750_s11 }
 0x37d   : > { %s1982_s21 = smov %s1735_s6  ;;  %21 = sbr.rel (!%p19_p4) target bundleno = 8 (0x8), region = 112 }
 0x382   :  { %1243 = vsyncpa [#allocation3], 1 }
 0x383   :  { %1245 = vsyncpa [#allocation3 + $0x1], 1 }
 0x384   :  { %1246 = vsyncpa [#allocation5], 1 }
 0x385   :  { %1248 = vsyncpa [#allocation5 + $0x1], 1 }
 0x386   :  { %1249 = vsyncpa [#allocation8], 1 }

</bundles_post_ra>
